<compile_context>
chip_gen: v7x
topology: tpu7x:2x2x1
jax: 0.10.0
libtpu: 0.0.40
codegen_flags: <defaults>
</compile_context>

<pallas_src>
import functools

import jax
import jax.numpy as jnp
from jax import lax
from jax.experimental import pallas as pl
from jax.experimental.pallas import tpu as pltpu

_LANES = 128
_SUBLANES = 8


def _kp_loss_kernel(out_ref, tgt_ref, part_ref, *, tile_rows, hw, needs_mask):
    """One (batch, row-tile) step: partial sums for this block.

    out_ref / tgt_ref: (1, 2, tile_rows, 128) lane-dense blocks.
        channel 0 = segmentation (pred is a logit), channel 1 = vector field.
    part_ref: (1, 1, 3) SMEM block -> [bce_sum, masked_sq_sum, valid_count].
    """
    pred_seg = out_ref[0, 0]
    pred_vec = out_ref[0, 1]
    targ_seg = tgt_ref[0, 0]
    targ_vec = tgt_ref[0, 1]

    # Accept bf16/f16 inputs; compute in f32 (no-op for f32 inputs).
    if pred_seg.dtype != jnp.float32:
        pred_seg = pred_seg.astype(jnp.float32)
        pred_vec = pred_vec.astype(jnp.float32)
        targ_seg = targ_seg.astype(jnp.float32)
        targ_vec = targ_vec.astype(jnp.float32)

    # Segmentation: element-wise BCE-with-logits, stable softplus (log1p) form.
    x, y = pred_seg, targ_seg
    bce = jnp.maximum(x, 0.0) - x * y + jnp.log1p(jnp.exp(-jnp.abs(x)))

    # Vector field: masked squared error; keep only where target_seg <= 0.1.
    keep = targ_seg <= 0.1
    diff = pred_vec - targ_vec
    sq = diff * diff

    if needs_mask:
        # Mask out the spatial padding added so H*W tiles evenly into
        # (tile_rows, 128) blocks.  Only compiled in when padding exists.
        rb = pl.program_id(1)
        rows = lax.broadcasted_iota(jnp.int32, (tile_rows, _LANES), 0)
        lanes = lax.broadcasted_iota(jnp.int32, (tile_rows, _LANES), 1)
        in_bounds = (rb * tile_rows + rows) * _LANES + lanes < hw
        bce = jnp.where(in_bounds, bce, 0.0)
        keep = jnp.logical_and(keep, in_bounds)

    sq = jnp.where(keep, sq, 0.0)
    cnt = jnp.where(keep, 1.0, 0.0)

    # Reductions are mostly VPU vreg-add trees with a tiny XLU tail; at 2 MiB of
    # input per step they hide under the HBM DMA.  Independent per-step writes
    # (no shared accumulator), so the whole grid stays parallel.
    part_ref[0, 0, 0] = jnp.sum(bce)
    part_ref[0, 0, 1] = jnp.sum(sq)
    part_ref[0, 0, 2] = jnp.sum(cnt)


def kp_vector_loss(output, target, *, max_tile_rows=2048):
    """output, target: [N, 2, H, W] float -> scalar float32 loss."""
    N, C, H, W = output.shape
    assert C == 2 and target.shape == output.shape
    hw = H * W

    # Lane-dense retiling: flatten spatial into rows of 128 lanes, pad the row
    # count up to an 8-aligned multiple of the row tile.  Reshape is free when
    # no padding is needed; otherwise a single cheap pad-copy.
    rows = pl.cdiv(hw, _LANES)
    rows_aligned = pl.cdiv(rows, _SUBLANES) * _SUBLANES
    tile_rows = min(max_tile_rows, rows_aligned)           # multiple of 8
    rows_padded = pl.cdiv(rows_aligned, tile_rows) * tile_rows
    row_blocks = rows_padded // tile_rows
    hw_padded = rows_padded * _LANES
    needs_mask = hw_padded != hw

    def to_lane_tiles(a):
        a = a.reshape(N, C, hw)
        if needs_mask:
            a = jnp.pad(a, ((0, 0), (0, 0), (0, hw_padded - hw)))
        return a.reshape(N, C, rows_padded, _LANES)

    out_t = to_lane_tiles(output)
    tgt_t = to_lane_tiles(target)

    kernel = functools.partial(
        _kp_loss_kernel, tile_rows=tile_rows, hw=hw, needs_mask=needs_mask)

    partials = pl.pallas_call(
        kernel,
        out_shape=jax.ShapeDtypeStruct((N, row_blocks, 3), jnp.float32),
        grid=(N, row_blocks),
        in_specs=[
            pl.BlockSpec((1, C, tile_rows, _LANES), lambda n, r: (n, 0, r, 0)),
            pl.BlockSpec((1, C, tile_rows, _LANES), lambda n, r: (n, 0, r, 0)),
        ],
        out_specs=pl.BlockSpec(
            (1, 1, 3), lambda n, r: (n, r, 0),
            memory_space=pltpu.MemorySpace.SMEM),
        compiler_params=pltpu.CompilerParams(
            dimension_semantics=("parallel", "parallel"),
            vmem_limit_bytes=32 * 1024 * 1024,
        ),
    )(out_t, tgt_t)

    sums = jnp.sum(partials, axis=(0, 1))            # (3,) pairwise f32 reduce
    seg_loss = sums[0] / jnp.float32(N * hw)          # mean BCE-with-logits
    vec_loss = sums[1] / sums[2]                      # MaskedMSELoss normalization
    # NOTE: like the PyTorch module, vec_loss is NaN/inf if no element has
    # target_seg <= 0.1 (division by a zero valid count); kept for parity.
    return seg_loss + vec_loss


def _reference_loss(output, target):
    """Pure-JAX reference mirroring the PyTorch module semantics."""
    pred_seg, pred_vec = output[:, 0], output[:, 1]
    targ_seg, targ_vec = target[:, 0], target[:, 1]
    x = pred_seg.astype(jnp.float32)
    y = targ_seg.astype(jnp.float32)
    bce = jnp.maximum(x, 0.0) - x * y + jnp.log1p(jnp.exp(-jnp.abs(x)))
    seg_loss = jnp.mean(bce)
    ignore = targ_seg > 0.1
    d = (pred_vec - targ_vec).astype(jnp.float32)
    sq = jnp.where(ignore, 0.0, d * d)
    vec_loss = jnp.sum(sq) / jnp.sum(jnp.logical_not(ignore))
    return seg_loss + vec_loss


if __name__ == "__main__":
    key = jax.random.PRNGKey(0)

    def make_case(k, n, h, w):
        k1, k2, k3, k4 = jax.random.split(k, 4)
        pred_seg = jax.random.normal(k1, (n, h, w), dtype=jnp.float32)  # logits
        pred_vec = jax.random.normal(k2, (n, h, w), dtype=jnp.float32)
        targ_seg = jax.random.uniform(k3, (n, h, w), dtype=jnp.float32)
        targ_vec = jax.random.normal(k4, (n, h, w), dtype=jnp.float32)
        out = jnp.stack([pred_seg, pred_vec], axis=1)    # [N, 2, H, W]
        tgt = jnp.stack([targ_seg, targ_vec], axis=1)    # [N, 2, H, W]
        return out, tgt

    ka, kb = jax.random.split(key)

    # Case 1: H*W = 256 (not (8,128)-tileable) -> exercises pad + bounds-mask path.
    out1, tgt1 = make_case(ka, 2, 16, 16)
    loss1 = jax.block_until_ready(kp_vector_loss(out1, tgt1))
    ref1 = jax.block_until_ready(_reference_loss(out1, tgt1))
    assert jnp.allclose(loss1, ref1, rtol=1e-5, atol=1e-5), (loss1, ref1)

    # Case 2: H*W = 1024 -> free reshape, no padding / no mask path.
    out2, tgt2 = make_case(kb, 2, 32, 32)
    loss2 = jax.block_until_ready(kp_vector_loss(out2, tgt2))
    ref2 = jax.block_until_ready(_reference_loss(out2, tgt2))
    assert jnp.allclose(loss2, ref2, rtol=1e-5, atol=1e-5), (loss2, ref2)

    print("KERNEL_OK")
</pallas_src>

<mosaic_0001>
module attributes {stable_mosaic.version = 11 : i64} {
  func.func @_kp_loss_kernel(%arg0: i32, %arg1: i32, %arg2: memref<1x2x8x128xf32, #tpu.memory_space<vmem>>, %arg3: memref<1x2x8x128xf32, #tpu.memory_space<vmem>>, %arg4: memref<1x1x3xf32, #tpu.memory_space<smem>>) attributes {dimension_semantics = [#tpu.dimension_semantics<parallel>, #tpu.dimension_semantics<parallel>], iteration_bounds = array<i64: 2, 1>, scalar_prefetch = 0 : i64, scratch_operands = 0 : i64, tpu.core_type = #tpu.core_type<tc>, window_params = [{transform_indices = @transform_0, window_bounds = array<i64: 1, 2, 8, 128>}, {transform_indices = @transform_1, window_bounds = array<i64: 1, 2, 8, 128>}, {transform_indices = @transform_2, window_bounds = array<i64: 1, 1, 3>}]} {
    %c0 = arith.constant 0 : index
    %c0_0 = arith.constant 0 : index
    %c0_1 = arith.constant 0 : index
    %c0_2 = arith.constant 0 : index
    %0 = vector.load %arg2[%c0, %c0_0, %c0_1, %c0_2] : memref<1x2x8x128xf32, #tpu.memory_space<vmem>>, vector<1x1x8x128xf32>
    %1 = vector.shape_cast %0 : vector<1x1x8x128xf32> to vector<8x128xf32>
    %c0_3 = arith.constant 0 : index
    %c1 = arith.constant 1 : index
    %c0_4 = arith.constant 0 : index
    %c0_5 = arith.constant 0 : index
    %2 = vector.load %arg2[%c0_3, %c1, %c0_4, %c0_5] : memref<1x2x8x128xf32, #tpu.memory_space<vmem>>, vector<1x1x8x128xf32>
    %3 = vector.shape_cast %2 : vector<1x1x8x128xf32> to vector<8x128xf32>
    %c0_6 = arith.constant 0 : index
    %c0_7 = arith.constant 0 : index
    %c0_8 = arith.constant 0 : index
    %c0_9 = arith.constant 0 : index
    %4 = vector.load %arg3[%c0_6, %c0_7, %c0_8, %c0_9] : memref<1x2x8x128xf32, #tpu.memory_space<vmem>>, vector<1x1x8x128xf32>
    %5 = vector.shape_cast %4 : vector<1x1x8x128xf32> to vector<8x128xf32>
    %c0_10 = arith.constant 0 : index
    %c1_11 = arith.constant 1 : index
    %c0_12 = arith.constant 0 : index
    %c0_13 = arith.constant 0 : index
    %6 = vector.load %arg3[%c0_10, %c1_11, %c0_12, %c0_13] : memref<1x2x8x128xf32, #tpu.memory_space<vmem>>, vector<1x1x8x128xf32>
    %7 = vector.shape_cast %6 : vector<1x1x8x128xf32> to vector<8x128xf32>
    %cst = arith.constant 0.000000e+00 : f32
    %8 = vector.broadcast %cst : f32 to vector<8x128xf32>
    %9 = arith.maximumf %1, %8 : vector<8x128xf32>
    %10 = arith.mulf %1, %5 : vector<8x128xf32>
    %11 = arith.subf %9, %10 : vector<8x128xf32>
    %12 = math.absf %1 : vector<8x128xf32>
    %cst_14 = arith.constant 0.000000e+00 : f32
    %13 = vector.broadcast %cst_14 : f32 to vector<8x128xf32>
    %14 = arith.subf %13, %12 : vector<8x128xf32>
    %15 = math.exp %14 : vector<8x128xf32>
    %16 = math.log1p %15 : vector<8x128xf32>
    %17 = arith.addf %11, %16 : vector<8x128xf32>
    %cst_15 = arith.constant 1.000000e-01 : f32
    %18 = vector.broadcast %cst_15 : f32 to vector<8x128xf32>
    %19 = arith.cmpf ole, %5, %18 : vector<8x128xf32>
    %20 = arith.subf %3, %7 : vector<8x128xf32>
    %21 = arith.mulf %20, %20 : vector<8x128xf32>
    %22 = tpu.iota {dimensions = array<i32: 0>} : vector<8x128xi32>
    %23 = tpu.iota {dimensions = array<i32: 1>} : vector<8x128xi32>
    %c8_i32 = arith.constant 8 : i32
    %24 = arith.muli %arg1, %c8_i32 : i32
    %25 = vector.broadcast %24 : i32 to vector<8x128xi32>
    %26 = arith.addi %25, %22 : vector<8x128xi32>
    %c128_i32 = arith.constant 128 : i32
    %27 = vector.broadcast %c128_i32 : i32 to vector<8x128xi32>
    %28 = arith.muli %26, %27 : vector<8x128xi32>
    %29 = arith.addi %28, %23 : vector<8x128xi32>
    %c256_i32 = arith.constant 256 : i32
    %30 = vector.broadcast %c256_i32 : i32 to vector<8x128xi32>
    %31 = arith.cmpi slt, %29, %30 : vector<8x128xi32>
    %cst_16 = arith.constant 0.000000e+00 : f32
    %32 = vector.broadcast %cst_16 : f32 to vector<8x128xf32>
    %33 = arith.select %31, %17, %32 : vector<8x128xi1>, vector<8x128xf32>
    %34 = arith.andi %19, %31 : vector<8x128xi1>
    %cst_17 = arith.constant 0.000000e+00 : f32
    %35 = vector.broadcast %cst_17 : f32 to vector<8x128xf32>
    %36 = arith.select %34, %21, %35 : vector<8x128xi1>, vector<8x128xf32>
    %cst_18 = arith.constant 1.000000e+00 : f32
    %cst_19 = arith.constant 0.000000e+00 : f32
    %37 = vector.broadcast %cst_18 : f32 to vector<8x128xf32>
    %38 = vector.broadcast %cst_19 : f32 to vector<8x128xf32>
    %39 = arith.select %34, %37, %38 : vector<8x128xi1>, vector<8x128xf32>
    %40 = vector.shape_cast %33 : vector<8x128xf32> to vector<1x8x128xf32>
    %cst_20 = arith.constant dense<0.000000e+00> : vector<1xf32>
    %41 = vector.multi_reduction <add>, %40, %cst_20 [1, 2] : vector<1x8x128xf32> to vector<1xf32>
    %42 = vector.shape_cast %41 : vector<1xf32> to vector<1x1x1xf32>
    %43 = vector.extract %42[0, 0, 0] : f32 from vector<1x1x1xf32>
    %c0_21 = arith.constant 0 : index
    %c0_22 = arith.constant 0 : index
    %c0_23 = arith.constant 0 : index
    %44 = memref.load %arg4[%c0_21, %c0_22, %c0_23] : memref<1x1x3xf32, #tpu.memory_space<smem>>
    memref.store %43, %arg4[%c0_21, %c0_22, %c0_23] : memref<1x1x3xf32, #tpu.memory_space<smem>>
    %45 = vector.shape_cast %36 : vector<8x128xf32> to vector<1x8x128xf32>
    %cst_24 = arith.constant dense<0.000000e+00> : vector<1xf32>
    %46 = vector.multi_reduction <add>, %45, %cst_24 [1, 2] : vector<1x8x128xf32> to vector<1xf32>
    %47 = vector.shape_cast %46 : vector<1xf32> to vector<1x1x1xf32>
    %48 = vector.extract %47[0, 0, 0] : f32 from vector<1x1x1xf32>
    %c0_25 = arith.constant 0 : index
    %c0_26 = arith.constant 0 : index
    %c1_27 = arith.constant 1 : index
    %49 = memref.load %arg4[%c0_25, %c0_26, %c1_27] : memref<1x1x3xf32, #tpu.memory_space<smem>>
    memref.store %48, %arg4[%c0_25, %c0_26, %c1_27] : memref<1x1x3xf32, #tpu.memory_space<smem>>
    %50 = vector.shape_cast %39 : vector<8x128xf32> to vector<1x8x128xf32>
    %cst_28 = arith.constant dense<0.000000e+00> : vector<1xf32>
    %51 = vector.multi_reduction <add>, %50, %cst_28 [1, 2] : vector<1x8x128xf32> to vector<1xf32>
    %52 = vector.shape_cast %51 : vector<1xf32> to vector<1x1x1xf32>
    %53 = vector.extract %52[0, 0, 0] : f32 from vector<1x1x1xf32>
    %c0_29 = arith.constant 0 : index
    %c0_30 = arith.constant 0 : index
    %c2 = arith.constant 2 : index
    %54 = memref.load %arg4[%c0_29, %c0_30, %c2] : memref<1x1x3xf32, #tpu.memory_space<smem>>
    memref.store %53, %arg4[%c0_29, %c0_30, %c2] : memref<1x1x3xf32, #tpu.memory_space<smem>>
    return
  }
  func.func @transform_0(%arg0: i32, %arg1: i32) -> (i32, i32, i32, i32) {
    %c0_i32 = arith.constant 0 : i32
    %c0_i32_0 = arith.constant 0 : i32
    %c0_i32_1 = arith.constant 0 : i32
    return %arg0, %c0_i32, %arg1, %c0_i32_0 : i32, i32, i32, i32
  }
  func.func @transform_1(%arg0: i32, %arg1: i32) -> (i32, i32, i32, i32) {
    %c0_i32 = arith.constant 0 : i32
    %c0_i32_0 = arith.constant 0 : i32
    %c0_i32_1 = arith.constant 0 : i32
    return %arg0, %c0_i32, %arg1, %c0_i32_0 : i32, i32, i32, i32
  }
  func.func @transform_2(%arg0: i32, %arg1: i32) -> (i32, i32, i32) {
    %c0_i32 = arith.constant 0 : i32
    %c0_i32_0 = arith.constant 0 : i32
    return %arg0, %arg1, %c0_i32 : i32, i32, i32
  }
}

</mosaic_0001>

<bundles_post_ra>
// kernel: tpu_custom_call.1
= control target key start
LH: loop header
LB: loop body
LE: loop exit
PB: predicated region body
PF: predicated region fallthrough
CT: control target
= control target key end

     0   :  { %7 = vsyncpa [#allocation3], 0  ;;  %s903_s0 = inlined_call_operand.hbm [shape: f32[2,2,8,128], index: 0, kind: input, shape index: {}]   ;;  %s904_s1 = inlined_call_operand.hbm [shape: f32[2,2,8,128], index: 1, kind: input, shape index: {}]   ;;  %s905_s2 = inlined_call_operand.hbm [shape: f32[2,1,3], index: 2, kind: output, shape index: {}]  }
   0x1   :  { %9 = vsyncpa [#allocation3 + $0x1], 0 }
   0x2   :  { %10 = vsyncpa [#allocation6], 0 }
   0x3   :  { %12 = vsyncpa [#allocation6 + $0x1], 0 }
   0x4   :  { %13 = vsyncpa [#allocation4], 0 }
   0x5   :  { %15 = vsyncpa [#allocation4 + $0x1], 0  ;;  %s666_s9 = smov 0   ;;  %s668_s10 = smov 0  }
   0x6   :  { %s670_s11 = smov 0   ;;  %s672_s12 = smov 0  }
   0x7   :  { %s674_s13 = smov 0   ;;  %s676_s14 = smov 0  }
   0x8 LB: > { %s415_s15 = sadd.s32 4294967295, %s644_s14   ;;  %s416_s16 = sadd.s32 4294967294, %s644_s14   ;;  %s644_s14 = sphi %s676_s14, %s21_s14   ;;  %s640_s13 = sphi %s674_s13, %s927_s13   ;;  %s636_s12 = sphi %s672_s12, %s926_s12   ;;  %s632_s11 = sphi %s670_s11, %s925_s11   ;;  %s628_s10 = sphi %s668_s10, %s924_s10   ;;  %s624_s9 = sphi %s666_s9, %s923_s9  }
   0x9   : > { %s33_s17 = sadd.s32 1, %s640_s13  ;;  %s42_s18 = sadd.s32 1, %s632_s11 }
   0xa   : > { %p35_p0 = scmp.ge.s32.totalorder %s33_s17, 2  ;;  %p49_p1 = scmp.ne.s32.totalorder %s632_s11, %s628_s10 }
   0xb   : > { %p50_p2 = scmp.eq.s32.totalorder %s644_s14, 0  ;;  %p55_p3 = scmp.ne.s32.totalorder %s628_s10, %s624_s9 }
   0xc   : > { %s929_s17 = smov (%p35_p0, %s33_s17), 0  ;;  %p56_p5 = scmp.eq.s32.totalorder %s415_s15, 0 }
   0xd   : > { %p707_p4 = por %p50_p2, %p49_p1  ;;  %s37_s20 = ssub.s32 %s640_s13, %s929_s17 }
   0xe   : > { %p109_p6 = scmp.eq.s32.totalorder %s415_s15, 1  ;;  %p40_p7 = scmp.eq.s32.totalorder %s37_s20, 0 }
   0xf   : > { %p713_p8 = por %p56_p5, %p55_p3  ;;  %p115_p10 = scmp.eq.s32.totalorder %s416_s16, 1 }
  0x10   : > { %p717_p9 = por %p109_p6, %p49_p1  ;;  %p906_p12 = scmp.lt.s32.totalorder %s644_s14, 2 }
  0x11   : > { %s911_s21 = scalar_select %p713_p8, 1, 0 }
  0x12   : > { %s912_s22 = scalar_select %p717_p9, 1, 0 }
  0x13   : > { %s722_s23 = scalar_select %p40_p7, %s632_s11, %s42_s18  }
  0x14   : > { %p724_p11 = por %p115_p10, %p55_p3  ;;  %s730_s25 = sand.u32 1, %s632_s11  }
  0x15   : > { %s419_s26 = sshll.u32 %s730_s25, 4  ;;  %s435_s27 = sshll.u32 %s640_s13, 8 }
  0x16   : > { %s913_s24 = scalar_select %p724_p11, 1, 0 }
  0x17   : > { %s739_s30 = scalar_lea.hbm %s903_s0, %s435_s27  ;;  %s139_s3 = scalar_lea.vmem [#allocation2], %s419_s26 }
  0x18   : > { %s147_s4 = sshll.u32 %s139_s3, 4  ;;  %p749_p13 = pnand %p906_p12, %p707_p4  ;;  %s743_s4 = int_to_ptr.vmem [resolvable:$true] %s147_s4 }
  0x19   : > { %s136_s6 = scalar_lea.sflag [#allocation3], %s730_s25  ;;  %s512_s7 = scalar_lea.hbm %s739_s30, 256 }
  0x1a   : > { %p513_p1 = scmp.ne.s32.totalorder %s739_s30, %s512_s7  ;;  %p514_p2 = pneg %p749_p13 }
  0x1b   : > { %s517_s16 = scalar_lea.hbm %s903_s0, 512  ;;  %p518_p4 = scmp.lt.u32.totalorder %s739_s30, %s903_s0 }
  0x1c   : > { %p515_p3 = pnand %p514_p2, %p513_p1  ;;  %p519_p6 = scmp.lt.u32.totalorder %s517_s16, %s512_s7 }
  0x1d   : > { %p521_p10 = scmp.lt.u32.totalorder %s512_s7, %s739_s30 }
  0x1e   : > { %p516_p5 = pneg %p515_p3  ;;  %p520_p7 = por %p519_p6, %p518_p4 }
  0x20   : > { %p522_p12 = por %p521_p10, %p520_p7 }
  0x22   : > { %p523_p0 = pnand %p522_p12, %p516_p5 }
  0x24   : > { %526 = shalt.err (!%p523_p0)
}
  0x25   : > { %s527_s20 = scalar_lea.vmem %s743_s4, 256  ;;  %s646_s28 = smov [#allocation2]  }
  0x26   : > { %p528_p1 = scmp.ne.s32.totalorder %s743_s4, %s527_s20  ;;  %s532_s29 = sshll.u32 %s646_s28, 4  ;;  %s533_s29 = int_to_ptr.vmem [resolvable:$false] %s532_s29 }
  0x27   : > { %s534_s3 = scalar_lea.vmem %s533_s29, 512  ;;  %p535_p9 = scmp.lt.s32.totalorder %s743_s4, %s533_s29 }
  0x28   : > { %p530_p3 = pnand %p528_p1, %p514_p2  ;;  %p536_p4 = scmp.lt.s32.totalorder %s534_s3, %s527_s20 }
  0x2a   : > { %p531_p11 = pneg %p530_p3  ;;  %p537_p6 = por %p536_p4, %p535_p9 }
  0x2c   : > { %p538_p7 = pnand %p537_p6, %p531_p11 }
  0x2e   : > { %541 = shalt.err (!%p538_p7)
}
  0x2f   : > { %s647_s7 = smov 128   ;;  %s648_s8 = smov 8  }
  0x30   : > { %452 = dma.hbm_to_vmem [thread:$0]  (!%p749_p13), %s739_s30, 256, %s743_s4, %s136_s6, %s647_s7, %s647_s7, %s648_s8  }
  0x31   : > { %p177_p9 = scmp.lt.s32.totalorder %s644_s14, 3  ;;  %s791_s18 = scalar_lea.hbm %s904_s1, %s435_s27 }
  0x32   : > { %p915_p11 = scmp.ge.s32.totalorder %s644_s14, 1  ;;  %s161_s20 = scalar_lea.vmem [#allocation5], %s419_s26 }
  0x33   : > { %s169_s28 = sshll.u32 %s161_s20, 4  ;;  %s158_s30 = scalar_lea.sflag [#allocation6], %s730_s25  ;;  %s801_s28 = int_to_ptr.vmem [resolvable:$true] %s169_s28 }
  0x34   : > { %p795_p12 = pnand %p915_p11, %p177_p9  ;;  %s542_s4 = scalar_lea.hbm %s791_s18, 256 }
  0x35   : > { %p543_p0 = scmp.ne.s32.totalorder %s791_s18, %s542_s4  ;;  %s547_s29 = scalar_lea.hbm %s904_s1, 512 }
  0x36   : > { %p548_p1 = scmp.lt.u32.totalorder %s791_s18, %s904_s1  ;;  %p549_p3 = scmp.lt.u32.totalorder %s547_s29, %s542_s4 }
  0x37   : > { %p545_p5 = pnand %p543_p0, %p514_p2  ;;  %p551_p6 = scmp.lt.u32.totalorder %s542_s4, %s791_s18 }
  0x38   : > { %p550_p4 = por %p549_p3, %p548_p1 }
  0x39   : > { %p546_p10 = pneg %p545_p5 }
  0x3a   : > { %p552_p7 = por %p551_p6, %p550_p4 }
  0x3c   : > { %p553_p9 = pnand %p552_p7, %p546_p10 }
  0x3e   : > { %556 = shalt.err (!%p553_p9)
}
  0x3f   : > { %s557_s26 = scalar_lea.vmem %s801_s28, 256  ;;  %s649_s16 = smov [#allocation5]  }
  0x40   : > { %p558_p11 = scmp.ne.s32.totalorder %s801_s28, %s557_s26  ;;  %s562_s20 = sshll.u32 %s649_s16, 4  ;;  %s563_s20 = int_to_ptr.vmem [resolvable:$false] %s562_s20 }
  0x41   : > { %s564_s27 = scalar_lea.vmem %s563_s20, 512  ;;  %p565_p8 = scmp.lt.s32.totalorder %s801_s28, %s563_s20 }
  0x42   : > { %p560_p0 = pnand %p558_p11, %p514_p2  ;;  %p566_p1 = scmp.lt.s32.totalorder %s564_s27, %s557_s26 }
  0x44   : > { %p561_p5 = pneg %p560_p0  ;;  %p567_p3 = por %p566_p1, %p565_p8 }
  0x46   : > { %p568_p4 = pnand %p567_p3, %p561_p5 }
  0x48   : > { %571 = shalt.err (!%p568_p4)
}
  0x49   : > { %455 = dma.hbm_to_vmem [thread:$0]  (!%p749_p13), %s791_s18, 256, %s801_s28, %s158_s30, %s647_s7, %s647_s7, %s648_s8  }
  0x4a   : > { %181 = sbr.rel (%p795_p12) target bundleno = 334 (0x14e), region = 28  ;;  %s835_s4 = sand.u32 (!%p795_p12), 1, %s628_s10  }
  0x4b   : > { %s426_s6 = sshll.u32 (!%p795_p12), %s835_s4, 4  ;;  %s184_s29 = scalar_lea.sflag (!%p795_p12), [#allocation3], %s835_s4 }
  0x4c   : > { %s839_s5 = scalar_lea.vmem (!%p795_p12), [#allocation2], %s426_s6  ;;  %p917_p8 = scmp.ne.s32.totalorder (!%p795_p12), %s911_s21, 0 }
  0x51   : > { %611 = dma.done.wait (%p917_p8), %s184_s29, 256  }
  0x52   : > { %613 = vsyncadd (%p917_p8), %s184_s29, 4294967040  ;;  %s193_s25 = scalar_lea.sflag [#allocation6], %s835_s4  ;;  %s196_s7 = scalar_lea.vmem [#allocation5], %s426_s6 }
  0x53   : > { %615 = dma.done.wait (%p917_p8), %s193_s25, 256  }
  0x54   : > { %617 = vsyncadd (%p917_p8), %s193_s25, 4294967040  ;;  %v248_v0 = vlaneseq  ;;  %v225_v5 = vld [vmem:[%s196_s7] sm:$0xff]  ;;  %v650_v9 = vmov 0.0   ;;  %v429_v20 = vld [vmem:[%s839_s5 + $0x8] sm:$0xff]  ;;  %s428_s21 = sshll.u32 %s835_s4, 7  ;;  %s432_s19 = sshll.u32 %s636_s12, 4 }
  0x55   : > { %v222_v6 = vld [vmem:[%s839_s5] sm:$0xff]  ;;  %vm245_vm0 = vcmp.le.f32.partialorder %v225_v5, 0.1  ;;  %v430_v21 = vld [vmem:[%s196_s7 + $0x8] sm:$0xff]  ;;  %s221_s18 = scalar_lea.smem [#allocation7], %s428_s21  ;;  %s308_s16 = scalar_lea.hbm %s905_s2, %s432_s19 }
  0x56   : > { %v249_v1 = vshrl.u32 %v248_v0, 7  ;;  %v251_v2 = vand.u32 127, %v248_v0  ;;  %v231_v7 = vand.u32 2147483647, %v222_v6  ;;  %v229_v17 = vmul.f32 %v225_v5, %v222_v6  ;;  %s282_s28 = scalar_lea.smem %s221_s18, 1 [#allocation7]  ;;  %s293_s30 = scalar_lea.smem %s221_s18, 2 [#allocation7] }
  0x57   : > { %v228_v18 = vmax.f32 %v222_v6, 0.0  ;;  %v246_v25 = vsub.f32 %v429_v20, %v430_v21  ;;  %s296_s27 = scalar_lea.sflag [#allocation4], %s835_s4  ;;  %s572_s6 = scalar_lea.hbm %s308_s16, 16 }
  0x58   : > { %v255_v3 = vmul.u32 128, %v249_v1  ;;  %v232_v11 = vsub.f32 0.0, %v231_v7  ;;  %p573_p13 = scmp.ne.s32.totalorder %s308_s16, %s572_s6  ;;  %p920_p2 = scmp.ne.s32.totalorder %s912_s22, 0 }
  0x59   : > { %v230_v24 = vsub.f32 %v228_v18, %v229_v17  ;;  %v247_v29 = vmul.f32 %v246_v25, %v246_v25  ;;  %s576_s12 = scalar_lea.hbm %s905_s2, 32  ;;  %p577_p6 = scmp.lt.u32.totalorder %s308_s16, %s905_s2 }
  0x5a   : > { %v256_v4 = vadd.s32 %v255_v3, %v251_v2  ;;  %v233_v12 = vmul.f32 1.442695, %v232_v11  ;;  %p574_p12 = pnand %p573_p13, %p920_p2  ;;  %p578_p7 = scmp.lt.u32.totalorder %s576_s12, %s572_s6 }
  0x5b   : > { %p580_p11 = scmp.lt.u32.totalorder %s572_s6, %s308_s16 }
  0x5c   : > { %vm257_vm1 = vcmp.lt.s32.totalorder %v256_v4, 256  ;;  %508 = vpow2.f32 %v233_v12  ;;  %p575_p10 = pneg %p574_p12  ;;  %p579_p9 = por %p578_p7, %p577_p6 }
  0x5d   : > { %vm852_vm2 = vmand %vm245_vm0, %vm257_vm1 }
  0x5e   : > { %v261_v10 = vsel %vm852_vm2, 1.0, %v650_v9  ;;  %v260_v31 = vsel %vm852_vm2, %v247_v29, 0.0  ;;  %p581_p0 = por %p580_p11, %p579_p9 }
  0x5f   : > { %284 = vadd.xlane.f32.xlu1 %v261_v10 }
  0x60   : > { %p582_p5 = pnand %p581_p0, %p575_p10 }
  0x66   : > { %v509_v13 = vpop.eup %508 }
  0x67   : > { %v235_v14 = vadd.f32 1.0, %v509_v13  ;;  %v238_v15 = vmul.f32 -0.5, %v509_v13  ;;  %v241_v19 = vand.u32 2147483647, %v509_v13 }
  0x69   : > { %510 = vlog2.f32 %v235_v14  ;;  %v239_v16 = vadd.f32 1.0, %v238_v15  ;;  %vm242_vm3 = vcmp.lt.f32.partialorder %v241_v19, 0.0004427343 }
  0x6b   : > { %v240_v22 = vmul.f32 %v509_v13, %v239_v16 }
  0x73   : > { %v511_v23 = vpop.eup %510 }
  0x74   : > { %v237_v26 = vmul.f32 0.6931472, %v511_v23 }
  0x76   : > { %v243_v27 = vsel %vm242_vm3, %v240_v22, %v237_v26 }
  0x77   : > { %v244_v28 = vadd.f32 %v243_v27, %v230_v24 }
  0x79   : > { %v258_v30 = vsel %vm257_vm1, %v244_v28, 0.0 }
  0x7a   : > { %262 = vadd.xlane.f32.xlu0 %v258_v30 }
  0x7e   : > { %273 = vadd.xlane.f32.xlu0 %v260_v31 }
  0xec   : > { %v285_v32 = vpop.xlane.xlu1 %284 }
  0xed   : > { %v286_v33 = vrot.slane %v285_v32, 4 }
  0xef   : > { %v287_v34 = vadd.f32 %v286_v33, %v285_v32 }
  0xf1   : > { %v288_v38 = vrot.slane %v287_v34, 2 }
  0xf3   : > { %v289_v44 = vadd.f32 %v288_v38, %v287_v34 }
  0xf5   : > { %v290_v49 = vrot.slane %v289_v44, 1 }
  0xf7   : > { %v291_v52 = vadd.f32 %v290_v49, %v289_v44 }
 0x107   : > { %v263_v35 = vpop.xlane.xlu0 %262 }
 0x108   : > { %v264_v36 = vrot.slane %v263_v35, 4 }
 0x10a   : > { %v265_v37 = vadd.f32 %v264_v36, %v263_v35 }
 0x10b   : > { %v274_v39 = vpop.xlane.xlu0 %273 }
 0x10c   : > { %v266_v40 = vrot.slane %v265_v37, 2  ;;  %v275_v41 = vrot.slane %v274_v39, 4 }
 0x10e   : > { %v276_v42 = vadd.f32 %v275_v41, %v274_v39  ;;  %v267_v43 = vadd.f32 %v266_v40, %v265_v37 }
 0x110   : > { %v277_v45 = vrot.slane %v276_v42, 2  ;;  %v268_v46 = vrot.slane %v267_v43, 1 }
 0x112   : > { %v278_v47 = vadd.f32 %v277_v45, %v276_v42  ;;  %v269_v48 = vadd.f32 %v268_v46, %v267_v43 }
 0x114   : > { %437 = vpush %v269_v48  ;;  %v279_v50 = vrot.slane %v278_v47, 1 }
 0x116   : > { %v280_v51 = vadd.f32 %v279_v50, %v278_v47 }
 0x118   : > { %439 = vpush %v280_v51 }
 0x119   : > { %441 = vpush %v291_v52 }
 0x145   : > { %s438_s8 = spop %437 }
 0x146   : > { %272 = sst [smem:[%s221_s18]] %s438_s8 }
 0x149   : > { %s440_s3 = spop %439 }
 0x14a   : > { %283 = sst [smem:[%s282_s28]] %s440_s3  ;;  %s442_s20 = spop %441 }
 0x14b   : > { %294 = sst [smem:[%s293_s30]] %s442_s20 }
 0x14c   : > { %585 = shalt.err (!%p582_p5)
}
 0x14d   : > { %447 = dma.smem_to_hbm (%p920_p2), %s221_s18, 16, %s308_s16, %s296_s27  }
 0x14e PF: > { %p921_p1 = scmp.lt.s32.totalorder %s644_s14, 2 }
 0x14f   : > { %s320_s4 = sand.u32 (!%p921_p1), 1, %s624_s9   ;;  %p922_p3 = scmp.ne.s32.totalorder (!%p921_p1), %s913_s24, 0 }
 0x150   : > { %315 = sbr.rel (%p921_p1) target bundleno = 346 (0x15a), region = 44  ;;  %s321_s21 = scalar_lea.sflag (!%p921_p1), [#allocation4], %s320_s4 }
 0x157   : > { %619 = dma.done.wait (%p922_p3), %s321_s21, 16  }
 0x158   : > { %621 = vsyncadd (%p922_p3), %s321_s21, 4294967280 }
 0x159   : > { %326 = sfence }
 0x15a PF: > { %s21_s14 = sadd.s32 1, %s644_s14   ;;  %s923_s9 = smov %s628_s10 }
 0x15b   : > { %p18_p4 = scmp.ge.s32.totalorder %s21_s14, 4   ;;  %s924_s10 = smov %s632_s11 }
 0x15c   : > { %s925_s11 = smov %s722_s23  ;;  %s926_s12 = smov %s640_s13 }
 0x15d   : > { %s927_s13 = smov %s929_s17  ;;  %20 = sbr.rel (!%p18_p4) target bundleno = 8 (0x8), region = 91 }
 0x164   :  { %327 = vsyncpa [#allocation3], 1 }
 0x165   :  { %329 = vsyncpa [#allocation3 + $0x1], 1 }
 0x166   :  { %330 = vsyncpa [#allocation6], 1 }
 0x167   :  { %332 = vsyncpa [#allocation6 + $0x1], 1 }
 0x168   :  { %333 = vsyncpa [#allocation4], 1 }
 0x169   :  { %335 = vsyncpa [#allocation4 + $0x1], 1 }

</bundles_post_ra>
